<compile_context>
chip_gen: v7x
topology: tpu7x:2x2x1
jax: 0.10.0
libtpu: 0.0.40
codegen_flags: <defaults>
</compile_context>

<pallas_src>
import jax
import jax.numpy as jnp
from jax import lax
from jax.experimental import pallas as pl
from jax.experimental.pallas import tpu as pltpu


def _attention_head_kernel(x_ref, w_ref, o_ref):
    # x_ref: (Bblk, T, C) f32   w_ref: (3H, C) bf16   o_ref: (Bblk, T, H) f32
    Bb, T, C = x_ref.shape
    H = o_ref.shape[-1]

    # Collapse (Bblk, T) into one row axis and feed the MXU bf16 operands.
    x = x_ref[...].reshape(Bb * T, C).astype(jnp.bfloat16)   # (Bb*T, C)
    w = w_ref[...]                                           # (3H, C) bf16

    # Fused QKV projection: contract on C (weights stay untransposed).
    qkv = lax.dot_general(
        x, w,
        dimension_numbers=(((1,), (1,)), ((), ())),
        preferred_element_type=jnp.float32)                  # (Bb*T, 3H) f32
    qkv = qkv.reshape(Bb, T, 3 * H)

    # The module scales scores by C^{-0.5} (num_embed, not head_size). Folding
    # the scale into q (Bb*T*H elems) is cheaper than scaling wei (Bb*T*T)
    # whenever T > H, and mathematically identical.
    scale = float(C) ** -0.5
    k = qkv[:, :, 0 * H:1 * H]                               # (Bb, T, H) f32
    q = qkv[:, :, 1 * H:2 * H] * scale
    v = qkv[:, :, 2 * H:3 * H]

    # scores = (q * scale) @ k^T  (batched contraction on H; no k transpose).
    wei = lax.dot_general(
        q.astype(jnp.bfloat16), k.astype(jnp.bfloat16),
        dimension_numbers=(((2,), (2,)), ((0,), (0,))),
        preferred_element_type=jnp.float32)                  # (Bb, T, T) f32

    # Causal mask (built once per grid step, shared across the batch block).
    row = lax.broadcasted_iota(jnp.int32, (T, T), 0)
    col = lax.broadcasted_iota(jnp.int32, (T, T), 1)
    causal = (col <= row)[None, :, :]
    wei = jnp.where(causal, wei, -jnp.inf)

    # Numerically-stable softmax in f32; reciprocal goes to the EUP slot.
    wei = wei - jnp.max(wei, axis=-1, keepdims=True)
    wei = jnp.exp(wei)
    inv_denom = pl.reciprocal(jnp.sum(wei, axis=-1, keepdims=True), approx=True)
    wei = wei * inv_denom

    # TODO(synk): nn.Dropout is identity in eval mode; training-mode dropout on
    # `wei` would need pltpu.prng_seed + pltpu.stateful_bernoulli.

    # out = wei @ v  (batched; bf16 operands, f32 accumulation).
    out = lax.dot_general(
        wei.astype(jnp.bfloat16), v.astype(jnp.bfloat16),
        dimension_numbers=(((2,), (1,)), ((0,), (0,))),
        preferred_element_type=jnp.float32)                  # (Bb, T, H)
    o_ref[...] = out.astype(o_ref.dtype)


def attention_head(x, w_key, w_query, w_value, *, block_b=None):
    """x: (B, T, C) float32; w_*: (H, C) PyTorch-Linear-style weights (no bias)."""
    B, T, C = x.shape
    H = w_key.shape[0]

    # Largest batch block <= 8 that divides B (amortizes per-grid-step cost
    # while keeping the per-step VMEM footprint small).
    if block_b is None:
        block_b = min(B, 8)
        while B % block_b:
            block_b -= 1

    # Fused QKV weight, untransposed (3H, C), cast to bf16 once (MXU operand).
    w_qkv = jnp.concatenate([w_key, w_query, w_value], axis=0).astype(jnp.bfloat16)

    return pl.pallas_call(
        _attention_head_kernel,
        out_shape=jax.ShapeDtypeStruct((B, T, H), x.dtype),
        grid_spec=pltpu.PrefetchScalarGridSpec(
            num_scalar_prefetch=0,
            grid=(B // block_b,),
            in_specs=[
                pl.BlockSpec((block_b, T, C), lambda b: (b, 0, 0)),
                pl.BlockSpec((3 * H, C), lambda b: (0, 0)),
            ],
            out_specs=pl.BlockSpec((block_b, T, H), lambda b: (b, 0, 0)),
        ),
        compiler_params=pltpu.CompilerParams(
            dimension_semantics=("parallel",),
        ),
    )(x, w_qkv)


def _reference(x, w_key, w_query, w_value):
    """Pure-JAX f32 reference mirroring the PyTorch forward (eval mode)."""
    B, T, C = x.shape
    k = x @ w_key.T
    q = x @ w_query.T
    v = x @ w_value.T
    wei = (q @ jnp.swapaxes(k, -2, -1)) * (C ** -0.5)
    mask = jnp.tril(jnp.ones((T, T), dtype=bool))
    wei = jnp.where(mask[None, :, :], wei, -jnp.inf)
    wei = jax.nn.softmax(wei, axis=-1)
    return wei @ v


if __name__ == "__main__":
    # Small shapes consistent with the module:
    #   batch B=2, seq T=8 (block_size), num_embed C=32, head_size H=16
    B, T, C, H = 2, 8, 32, 16
    key = jax.random.PRNGKey(0)
    kx, kk, kq, kv = jax.random.split(key, 4)

    x = jax.random.normal(kx, (B, T, C), dtype=jnp.float32)
    # nn.Linear weights of shape (head_size, num_embed), no bias.
    w_key = jax.random.normal(kk, (H, C), dtype=jnp.float32) * 0.1
    w_query = jax.random.normal(kq, (H, C), dtype=jnp.float32) * 0.1
    w_value = jax.random.normal(kv, (H, C), dtype=jnp.float32) * 0.1

    out = attention_head(x, w_key, w_query, w_value)
    out = jax.block_until_ready(out)

    ref = _reference(x, w_key, w_query, w_value)
    assert out.shape == (B, T, H)
    # bf16 MXU operands + approx reciprocal -> relaxed tolerance vs f32 reference.
    assert jnp.allclose(out, ref, atol=3e-2, rtol=3e-2), "mismatch vs reference"

    print("KERNEL_OK")
</pallas_src>

<mosaic_0001>
module attributes {stable_mosaic.version = 11 : i64} {
  func.func @_attention_head_kernel(%arg0: i32, %arg1: memref<2x8x32xf32, #tpu.memory_space<vmem>>, %arg2: memref<48x32xbf16, #tpu.memory_space<vmem>>, %arg3: memref<2x8x16xf32, #tpu.memory_space<vmem>>) attributes {dimension_semantics = [#tpu.dimension_semantics<parallel>], iteration_bounds = array<i64: 1>, scalar_prefetch = 0 : i64, scratch_operands = 0 : i64, tpu.core_type = #tpu.core_type<tc>, window_params = [{transform_indices = @transform_0, window_bounds = array<i64: 2, 8, 32>}, {pipeline_mode = #tpu.pipeline_mode<synchronous>, transform_indices = @transform_1, window_bounds = array<i64: 48, 32>}, {transform_indices = @transform_2, window_bounds = array<i64: 2, 8, 16>}]} {
    %c0 = arith.constant 0 : index
    %c0_0 = arith.constant 0 : index
    %c0_1 = arith.constant 0 : index
    %0 = vector.load %arg1[%c0, %c0_0, %c0_1] : memref<2x8x32xf32, #tpu.memory_space<vmem>>, vector<2x8x32xf32>
    %1 = vector.shape_cast %0 : vector<2x8x32xf32> to vector<16x32xf32>
    %2 = arith.truncf %1 : vector<16x32xf32> to vector<16x32xbf16>
    %c0_2 = arith.constant 0 : index
    %c0_3 = arith.constant 0 : index
    %3 = vector.load %arg2[%c0_2, %c0_3] : memref<48x32xbf16, #tpu.memory_space<vmem>>, vector<48x32xbf16>
    %cst = arith.constant dense<0.000000e+00> : vector<16x48xf32>
    %4 = tpu.matmul %2, %3, %cst {dimension_numbers = #tpu.dot_dimension_numbers<[1], [1], [0], [0], [0, 0, 1, 0], [], []>} : vector<16x32xbf16>, vector<48x32xbf16>, vector<16x48xf32> -> vector<16x48xf32>
    %5 = vector.shape_cast %4 : vector<16x48xf32> to vector<2x8x48xf32>
    %6 = vector.extract_strided_slice %5 {offsets = [0, 0, 0], sizes = [2, 8, 16], strides = [1, 1, 1]} : vector<2x8x48xf32> to vector<2x8x16xf32>
    %7 = vector.extract_strided_slice %5 {offsets = [0, 0, 16], sizes = [2, 8, 16], strides = [1, 1, 1]} : vector<2x8x48xf32> to vector<2x8x16xf32>
    %cst_4 = arith.constant 0.176776692 : f32
    %8 = vector.broadcast %cst_4 : f32 to vector<2x8x16xf32>
    %9 = arith.mulf %7, %8 : vector<2x8x16xf32>
    %10 = vector.extract_strided_slice %5 {offsets = [0, 0, 32], sizes = [2, 8, 16], strides = [1, 1, 1]} : vector<2x8x48xf32> to vector<2x8x16xf32>
    %11 = arith.truncf %9 : vector<2x8x16xf32> to vector<2x8x16xbf16>
    %12 = arith.truncf %6 : vector<2x8x16xf32> to vector<2x8x16xbf16>
    %cst_5 = arith.constant dense<0.000000e+00> : vector<2x8x8xf32>
    %13 = tpu.matmul %11, %12, %cst_5 {dimension_numbers = #tpu.dot_dimension_numbers<[2], [2], [1], [1], [0, 0, 0, 1, 1, 1], [0], [0]>} : vector<2x8x16xbf16>, vector<2x8x16xbf16>, vector<2x8x8xf32> -> vector<2x8x8xf32>
    %14 = tpu.iota {dimensions = array<i32: 0>} : vector<8x8xi32>
    %15 = tpu.iota {dimensions = array<i32: 1>} : vector<8x8xi32>
    %16 = arith.cmpi sle, %15, %14 : vector<8x8xi32>
    %17 = vector.shape_cast %16 : vector<8x8xi1> to vector<1x8x8xi1>
    %cst_6 = arith.constant 0xFF800000 : f32
    %18 = vector.shape_cast %17 : vector<1x8x8xi1> to vector<1x8x8xi1>
    %19 = vector.broadcast %18 : vector<1x8x8xi1> to vector<2x8x8xi1>
    %20 = vector.broadcast %cst_6 : f32 to vector<2x8x8xf32>
    %21 = arith.select %19, %13, %20 : vector<2x8x8xi1>, vector<2x8x8xf32>
    %cst_7 = arith.constant dense<0xFF800000> : vector<2x8xf32>
    %22 = vector.multi_reduction <maximumf>, %21, %cst_7 [2] : vector<2x8x8xf32> to vector<2x8xf32>
    %23 = vector.shape_cast %22 : vector<2x8xf32> to vector<2x8x1xf32>
    %24 = vector.broadcast %23 : vector<2x8x1xf32> to vector<2x8x8xf32>
    %25 = arith.subf %21, %24 : vector<2x8x8xf32>
    %26 = math.exp %25 : vector<2x8x8xf32>
    %cst_8 = arith.constant dense<0.000000e+00> : vector<2x8xf32>
    %27 = vector.multi_reduction <add>, %26, %cst_8 [2] : vector<2x8x8xf32> to vector<2x8xf32>
    %28 = vector.shape_cast %27 : vector<2x8xf32> to vector<2x8x1xf32>
    %29 = tpu.reciprocal %28 {approx = true} : vector<2x8x1xf32> -> vector<2x8x1xf32>
    %30 = vector.broadcast %29 : vector<2x8x1xf32> to vector<2x8x8xf32>
    %31 = arith.mulf %26, %30 : vector<2x8x8xf32>
    %32 = arith.truncf %31 : vector<2x8x8xf32> to vector<2x8x8xbf16>
    %33 = arith.truncf %10 : vector<2x8x16xf32> to vector<2x8x16xbf16>
    %cst_9 = arith.constant dense<0.000000e+00> : vector<2x8x16xf32>
    %34 = tpu.matmul %32, %33, %cst_9 {dimension_numbers = #tpu.dot_dimension_numbers<[2], [1], [1], [2], [0, 0, 0, 1, 1, 2], [0], [0]>} : vector<2x8x8xbf16>, vector<2x8x16xbf16>, vector<2x8x16xf32> -> vector<2x8x16xf32>
    %c0_10 = arith.constant 0 : index
    %c0_11 = arith.constant 0 : index
    %c0_12 = arith.constant 0 : index
    %35 = vector.load %arg3[%c0_10, %c0_11, %c0_12] : memref<2x8x16xf32, #tpu.memory_space<vmem>>, vector<2x8x16xf32>
    tpu.vector_store %arg3[%c0_10, %c0_11, %c0_12], %34 {strides = array<i32>} : memref<2x8x16xf32, #tpu.memory_space<vmem>>, vector<2x8x16xf32>,
    return
  }
  func.func @transform_0(%arg0: i32) -> (i32, i32, i32) {
    %c0_i32 = arith.constant 0 : i32
    %c0_i32_0 = arith.constant 0 : i32
    %c0_i32_1 = arith.constant 0 : i32
    return %arg0, %c0_i32, %c0_i32_0 : i32, i32, i32
  }
  func.func @transform_1(%arg0: i32) -> (i32, i32) {
    %c0_i32 = arith.constant 0 : i32
    %c0_i32_0 = arith.constant 0 : i32
    %c0_i32_1 = arith.constant 0 : i32
    return %c0_i32, %c0_i32_0 : i32, i32
  }
  func.func @transform_2(%arg0: i32) -> (i32, i32, i32) {
    %c0_i32 = arith.constant 0 : i32
    %c0_i32_0 = arith.constant 0 : i32
    %c0_i32_1 = arith.constant 0 : i32
    return %arg0, %c0_i32, %c0_i32_0 : i32, i32, i32
  }
}

</mosaic_0001>

<bundles_post_ra>
// kernel: tpu_custom_call.1
= control target key start
LH: loop header
LB: loop body
LE: loop exit
PB: predicated region body
PF: predicated region fallthrough
CT: control target
= control target key end

     0   :  { %v443_v1 = vmov 0.0   ;;  %vm37_vm0 = vcmask 261120   ;;  %s515_s0 = inlined_call_operand.vmem [shape: f32[2,8,32], index: 0, kind: input, shape index: {}]   ;;  %s516_s1 = inlined_call_operand.vmem [shape: bf16[48,32], index: 1, kind: input, shape index: {}]   ;;  %s517_s2 = inlined_call_operand.hbm [shape: f32[2,8,16], index: 2, kind: output, shape index: {}]  }
   0x1   :  { %v408_v0 = vld [vmem:[%s516_s1] sm:$0xff]   ;;  %367 = vmatprep.subr.bf16.mxu0 %v443_v1  ;;  %377 = vmatprep.subr.bf16.mxu1 %v443_v1 }
   0x2   :  { %v42_v2 = vsel %vm37_vm0, %v408_v0, 0 }
   0x3   :  { %368 = vmatpush3.bf16.xpose.msra.mxu0 %v42_v2 }
   0x4   :  { %7 = vsyncpa [#allocation3], 0  ;;  %369 = vmatprep.subr.bf16.mxu0 %v443_v1  ;;  %v409_v3 = vld [vmem:[%s516_s1 + $0x8] sm:$0xff]   ;;  %vm444_vm1 = vmmov 0   ;;  %v410_v5 = vld [vmem:[%s516_s1 + $0x10] sm:$0xff]   ;;  %vm100_vm2 = vcmask 130048   ;;  %v196_v24 = vlaneseq }
   0x5   :  { %373 = vmatprep.mubr.msk.bf16.mxu0 %vm444_vm1, %v443_v1  ;;  %379 = vmatprep.mubr.msk.bf16.mxu1 %vm444_vm1, %v443_v1  ;;  %v45_v4 = vsel %vm37_vm0, %v409_v3, 0  ;;  %v48_v6 = vsel %vm37_vm0, %v410_v5, 0  ;;  %v13_v7 = vld [vmem:[%s515_s0] sm:$0xff]  ;;  %v14_v8 = vld [vmem:[%s515_s0 + $0x8] sm:$0xff]  ;;  %s445_s1 = smov 112   ;;  %vm205_vm4 = vcmask 64512  }
   0x6   :  { %v15_v9 = vpack.c.bf16 %v14_v8, %v13_v7  ;;  %v197_v25 = vshrl.u32 %v196_v24, 7  ;;  %v199_v26 = vand.u32 127, %v196_v24  ;;  %s446_s0 = smov 96   ;;  %vm236_vm5 = vcmask 1043456   ;;  %s447_s19 = smov [#allocation2]  }
   0x7   :  { %s336_s20 = sshll.u32 %s447_s19, 4  ;;  %s337_s20 = int_to_ptr.vmem [resolvable:$true] %s336_s20 }
   0x8   :  { %vm200_vm3 = vcmp.le.s32.totalorder %v199_v26, %v197_v25  ;;  %s419_s21 = scalar_lea.vmem %s337_s20, 256  ;;  %p424_p1 = scmp.lt.s32.totalorder %s337_s20, %s337_s20 }
   0x9   :  { %p420_p0 = scmp.ne.s32.totalorder %s337_s20, %s419_s21  ;;  %p425_p2 = scmp.lt.s32.totalorder %s419_s21, %s419_s21 }
   0xb   :  { %370 = vmatpush3.bf16.xpose.msra.mxu0 %v45_v4  ;;  %p426_p3 = por %p425_p2, %p424_p1 }
   0xc   :  { %371 = vmatprep.subr.bf16.mxu0 %v443_v1 }
   0xd   :  { %p427_p4 = pnand %p426_p3, %p420_p0 }
  0x13   :  { %372 = vmatpush3.bf16.xpose.msra.mxu0 %v48_v6 }
  0x14   :  { %395 = vmatprep.subr.bf16.mxu0 %v443_v1 }
  0x1a   :  { %374 = vmatmul.mubr.msk.bf16.vlgmr.msra.gmra.mrb[0].mxu0 %vm37_vm0, %v15_v9 }
  0x1b   :  { %397 = vmatprep.mubr.msk.bf16.mxu0 %vm444_vm1, %v443_v1 }
  0xed   :  { %v84_v10 = vpop.f32.mrb[0].mxu0 }
  0xee   :  { %v91_v11 = vmul.f32 0.17677669, %v84_v10  ;;  %v95_v12 = vpack.c.bf16 %v84_v10, %v84_v10  ;;  %v375_v13 = vpop.f32.mrb[1].mxu0 }
  0xef   :  { %v87_v14 = vpop.f32.mrb[2].mxu0 }
  0xf0   :  { %v92_v15 = vmul.f32 0.17677669, %v87_v14  ;;  %v376_v16 = vpop.f32.mrb[3].mxu0  ;;  %v105_v17 = vsel %vm100_vm2, %v95_v12, 0  ;;  %v93_v18 = vpack.c.bf16 %v91_v11, %v91_v11  ;;  %v96_v20 = vpack.c.bf16 %v87_v14, %v87_v14 }
  0xf1   :  { %378 = vmatpush3.bf16.xpose.msra.mxu1 %v105_v17 }
  0xf2   :  { %98 = vrot.lane.b32.xlu0 %v93_v18, %s445_s1  ;;  %383 = vmatprep.subr.bf16.mxu1 %v443_v1  ;;  %v94_v19 = vpack.c.bf16 %v92_v15, %v92_v15  ;;  %v154_v22 = vsel %vm100_vm2, %v96_v20, 0 }
  0xf6   :  { %148 = vrot.lane.b32.xlu0 %v94_v19, %s445_s1 }
 0x164   :  { %v99_v21 = vpop.permute.xlu0 %98 }
 0x165   :  { %380 = vmatmul.mubr.msk.bf16.vlgmr.msra.gmra.mrb[0].mxu1 %vm100_vm2, %v99_v21 }
 0x166   :  { %384 = vmatpush3.bf16.xpose.msra.mxu1 %v154_v22  ;;  %385 = vmatprep.mubr.msk.bf16.mxu1 %vm444_vm1, %v443_v1 }
 0x167   :  { %389 = vmatprep.subr.bf16.mxu1 %v443_v1 }
 0x168   :  { %v149_v23 = vpop.permute.xlu0 %148 }
 0x16d   :  { %386 = vmatmul.mubr.msk.bf16.vlgmr.msra.gmra.mrb[4].mxu1 %vm100_vm2, %v149_v23 }
 0x16e   :  { %391 = vmatprep.mubr.msk.bf16.mxu1 %vm444_vm1, %v443_v1 }
 0x238   :  { %v141_v27 = vpop.f32.mrb[0].mxu1 }
 0x239   :  { %v203_v28 = vsel %vm200_vm3, %v141_v27, -inf  ;;  %v381_v29 = vpop.f32.mrb[1].mxu1 }
 0x23a   :  { %v144_v30 = vpop.f32.mrb[2].mxu1  ;;  %v206_v31 = vsel %vm205_vm4, %v203_v28, -inf }
 0x23b   :  { %207 = vmax.xlane.f32.xlu1 %v206_v31  ;;  %v382_v32 = vpop.f32.mrb[3].mxu1 }
 0x240   :  { %v190_v33 = vpop.f32.mrb[4].mxu1 }
 0x241   :  { %v204_v34 = vsel %vm200_vm3, %v190_v33, -inf  ;;  %v387_v35 = vpop.f32.mrb[5].mxu1 }
 0x242   :  { %v193_v36 = vpop.f32.mrb[6].mxu1  ;;  %v209_v37 = vsel %vm205_vm4, %v204_v34, -inf }
 0x243   :  { %210 = vmax.xlane.f32.xlu1 %v209_v37  ;;  %v388_v38 = vpop.f32.mrb[7].mxu1 }
 0x254   :  { %231 = vrot.lane.b32.xlu1 %v95_v12, %s446_s0 }
 0x2c8   :  { %v208_v39 = vpop.xlane.xlu1 %207 }
 0x2c9   :  { %v212_v40 = vsub.f32 %v203_v28, %v208_v39 }
 0x2cb   :  { %v214_v41 = vmul.f32 1.442695, %v212_v40 }
 0x2cd   :  { %411 = vpow2.f32 %v214_v41 }
 0x2d0   :  { %v211_v42 = vpop.xlane.xlu1 %210 }
 0x2d1   :  { %v213_v43 = vsub.f32 %v204_v34, %v211_v42 }
 0x2d3   :  { %v216_v44 = vmul.f32 1.442695, %v213_v43 }
 0x2d4   :  { %v232_v45 = vpop.permute.xlu1 %231 }
 0x2d5   :  { %413 = vpow2.f32 %v216_v44  ;;  %v238_v46 = vsel %vm236_vm5, %v232_v45, 0 }
 0x2d6   :  { %390 = vmatpush3.bf16.msra.mxu1 %v238_v46 }
 0x2d7   :  { %v412_v47 = vpop.eup %411 }
 0x2d8   :  { %v218_v48 = vsel %vm205_vm4, %v412_v47, 0.0 }
 0x2d9   :  { %219 = vadd.xlane.f32.xlu0 %v218_v48 }
 0x2df   :  { %v414_v49 = vpop.eup %413 }
 0x2e0   :  { %v221_v50 = vsel %vm205_vm4, %v414_v49, 0.0 }
 0x2e1   :  { %222 = vadd.xlane.f32.xlu1 %v221_v50 }
 0x2f2   :  { %281 = vrot.lane.b32.xlu1 %v96_v20, %s446_s0 }
 0x366   :  { %v220_v51 = vpop.xlane.xlu0 %219 }
 0x367   :  { %415 = vrcp.f32 %v220_v51 }
 0x36e   :  { %v223_v52 = vpop.xlane.xlu1 %222 }
 0x36f   :  { %417 = vrcp.f32 %v223_v52 }
 0x371   :  { %v416_v53 = vpop.eup %415 }
 0x372   :  { %v226_v54 = vmul.f32 %v416_v53, %v412_v47  ;;  %v282_v55 = vpop.permute.xlu1 %281 }
 0x373   :  { %v287_v56 = vsel %vm236_vm5, %v282_v55, 0 }
 0x374   :  { %v228_v57 = vpack.c.bf16 %v226_v54, %v226_v54  ;;  %396 = vmatpush3.bf16.msra.mxu0 %v287_v56 }
 0x376   :  { %392 = vmatmul.mubr.msk.bf16.vlgmr.msra.gmra.mrb[8].mxu1 %vm205_vm4, %v228_v57 }
 0x379   :  { %v418_v58 = vpop.eup %417 }
 0x37a   :  { %v227_v59 = vmul.f32 %v418_v58, %v414_v49 }
 0x37c   :  { %v229_v60 = vpack.c.bf16 %v227_v59, %v227_v59 }
 0x37e   :  { %398 = vmatmul.mubr.msk.bf16.vlgmr.msra.gmra.mrb[4].mxu0 %vm205_vm4, %v229_v60 }
 0x449   :  { %v274_v61 = vpop.f32.mrb[8].mxu1 }
 0x44a   :  { %329 = vst.msk [vmem:[#allocation2] sm:$0xff] %vm100_vm2, %v274_v61  ;;  %v393_v62 = vpop.f32.mrb[9].mxu1 }
 0x44b   :  { %v277_v63 = vpop.f32.mrb[10].mxu1 }
 0x44c   :  { %v394_v0 = vpop.f32.mrb[11].mxu1 }
 0x451   :  { %v323_v1 = vpop.f32.mrb[4].mxu0 }
 0x452   :  { %330 = vst.msk [vmem:[#allocation2 + $0x8] sm:$0xff] %vm100_vm2, %v323_v1  ;;  %v399_v2 = vpop.f32.mrb[5].mxu0 }
 0x453   :  { %v326_v3 = vpop.f32.mrb[6].mxu0 }
 0x454   :  { %430 = shalt.err (!%p427_p4)
}
 0x455   :  { %s431_s24 = scalar_lea.hbm %s517_s2, 256 }
 0x456   :  { %p432_p5 = scmp.ne.s32.totalorder %s517_s2, %s431_s24  ;;  %p435_p6 = scmp.lt.u32.totalorder %s431_s24, %s517_s2 }
 0x458   :  { %p437_p7 = pnand %p435_p6, %p432_p5 }
 0x45a   :  { %440 = shalt.err (!%p437_p7)
}
 0x45b   :  { %s448_s29 = smov 128   ;;  %s449_s30 = smov 8   ;;  %v400_v4 = vpop.f32.mrb[7].mxu0 }
 0x45c   :  { %342 = dma.vmem_to_hbm [thread:$0]  %s337_s20, 256, %s517_s2, [#allocation3], %s448_s29, %s448_s29, %s449_s30  }
 0x45d   :  { %441 = dma.done.wait [#allocation3], 256  }
 0x45e   :  { %442 = vsyncadd [#allocation3], 4294967040 }
 0x45f   :  { %346 = vsyncpa [#allocation3], 1 }

</bundles_post_ra>
